<compile_context>
chip_gen: v5e
topology: v5e:2x2
jax: 0.10.0
libtpu: 0.0.40
codegen_flags: <defaults>
</compile_context>

<pallas_src>
import jax
import jax.numpy as jnp
from jax.experimental import pallas as pl
from jax.experimental.pallas import tpu as pltpu


def _round_up(x, m):
    return (x + m - 1) // m * m


def sage_relu_kernel(a_ref, xk_ref, xi_ref, wcat_ref, b_ref, o_ref, acc_ref):
    # a_ref:    (tm, tk)   mean-aggregation tile A[i, k]
    # xk_ref:   (tk, 2F)   [x | 0]   features streamed along the reduction axis
    # xi_ref:   (tm, 2F)   [0 | x]   root-node features for this row tile
    # wcat_ref: (2F, Cp)   [W_l^T ; W_r^T], zero-padded to Cp=128 lanes
    # b_ref:    (1,  Cp)   bias (zero-padded)
    # o_ref:    (tm, Cp)   output tile (lane-dense)
    # acc_ref:  (tm, 2F)   f32 VMEM accumulator, holds [A@X | X] for the row tile
    k = pl.program_id(1)

    @pl.when(k == 0)
    def _init():
        # Seed accumulator with the root-feature half: acc = [0 | x_i].
        acc_ref[...] = xi_ref[...].astype(jnp.float32)

    # acc[:, :F] += A_tile @ X_tile  (second half of xk is zero -> root half
    # of the accumulator stays untouched).  One MXU matmul per grid step.
    acc_ref[...] += jnp.dot(
        a_ref[...], xk_ref[...], preferred_element_type=jnp.float32
    )

    @pl.when(k == pl.num_programs(1) - 1)
    def _finalize():
        # Fused feature matmul (K = 2F): [agg | x] @ [W_l^T ; W_r^T] + b, ReLU.
        out = (
            jnp.dot(acc_ref[...], wcat_ref[...], preferred_element_type=jnp.float32)
            + b_ref[...]
        )
        o_ref[...] = jnp.maximum(out, 0.0).astype(o_ref.dtype)


def gcn_forward(x, edge_index, w_l, w_r, b_l, *, use_bf16=False):
    """x: (N, F) f32; edge_index: (2, E) int32 (row0=src, row1=dst)."""
    N, F = x.shape
    C = w_l.shape[0]
    LANE = 128

    # ---- tile / padding choices --------------------------------------------
    if N <= 512:
        # Toy sizes: a single grid point per axis (avoid per-step overhead).
        tm = tk = _round_up(max(N, 8), LANE)
    else:
        # 512x512 f32 A tiles: big enough for ~85% HBM roofline, small enough
        # (double-buffered ~2 MiB) for v5e/v6e/v7x scoped VMEM limits.
        tm = tk = 512
    n_pad = _round_up(N, tm)        # tm == tk
    c_pad = _round_up(C, LANE)      # lane-dense output channel dim

    # ---- glue: dense mean-aggregation matrix (zero-padded) ------------------
    src = edge_index[0]
    dst = edge_index[1]
    adj = jnp.zeros((n_pad, n_pad), jnp.float32).at[dst, src].add(1.0)
    deg = jnp.zeros((n_pad,), jnp.float32).at[dst].add(1.0)
    a_mean = adj / jnp.maximum(deg, 1.0)[:, None]   # isolated/padded rows -> 0

    x_pad = jnp.zeros((n_pad, F), jnp.float32).at[:N, :].set(
        x.astype(jnp.float32)
    )
    zeros_f = jnp.zeros((n_pad, F), jnp.float32)
    # x_agg  = [x | 0]: contracted with A along the reduction (k) axis.
    # x_init = [0 | x]: root features, seeds the accumulator once per row tile.
    x_agg = jnp.concatenate([x_pad, zeros_f], axis=1)    # (n_pad, 2F)
    x_init = jnp.concatenate([zeros_f, x_pad], axis=1)   # (n_pad, 2F)

    # Fused weight [W_l^T ; W_r^T] and bias, zero-padded to c_pad lanes.
    wcat = (
        jnp.zeros((2 * F, c_pad), jnp.float32)
        .at[:F, :C].set(w_l.T)
        .at[F:, :C].set(w_r.T)
    )
    bias = jnp.zeros((1, c_pad), jnp.float32).at[0, :C].set(b_l)

    if use_bf16:
        # v6e/v7x: bf16 MXU runs full-rate and halves HBM/VMEM traffic for the
        # O(N^2) A operand (relax the correctness tolerance to ~1e-2 if used).
        a_mean = a_mean.astype(jnp.bfloat16)
        x_agg = x_agg.astype(jnp.bfloat16)
        x_init = x_init.astype(jnp.bfloat16)

    grid = (n_pad // tm, n_pad // tk)

    out = pl.pallas_call(
        sage_relu_kernel,
        out_shape=jax.ShapeDtypeStruct((n_pad, c_pad), jnp.float32),
        grid_spec=pltpu.PrefetchScalarGridSpec(
            num_scalar_prefetch=0,
            grid=grid,
            in_specs=[
                pl.BlockSpec((tm, tk), lambda i, k: (i, k)),        # A tile
                pl.BlockSpec((tk, 2 * F), lambda i, k: (k, 0)),     # [x | 0]
                pl.BlockSpec((tm, 2 * F), lambda i, k: (i, 0)),     # [0 | x]
                pl.BlockSpec((2 * F, c_pad), lambda i, k: (0, 0)),  # W_cat
                pl.BlockSpec((1, c_pad), lambda i, k: (0, 0)),      # bias
            ],
            out_specs=pl.BlockSpec((tm, c_pad), lambda i, k: (i, 0)),
            scratch_shapes=[pltpu.VMEM((tm, 2 * F), jnp.float32)],
        ),
        compiler_params=pltpu.CompilerParams(
            dimension_semantics=("parallel", "arbitrary"),
            vmem_limit_bytes=32 * 1024 * 1024,
        ),
    )(a_mean, x_agg, x_init, wcat, bias)

    return out[:N, :C]


def reference_forward(x, edge_index, w_l, w_r, b_l):
    """Pure-JAX reference of PyG SAGEConv(mean) + ReLU."""
    N = x.shape[0]
    src = edge_index[0]
    dst = edge_index[1]
    adj = jnp.zeros((N, N), jnp.float32).at[dst, src].add(1.0)
    deg = jnp.zeros((N,), jnp.float32).at[dst].add(1.0)
    a_mean = adj / jnp.maximum(deg, 1.0)[:, None]
    agg = a_mean @ x
    out = agg @ w_l.T + x @ w_r.T + b_l
    return jnp.maximum(out, 0.0)


if __name__ == "__main__":
    key = jax.random.PRNGKey(0)
    k_x, k_e, k_wl, k_wr, k_b = jax.random.split(key, 5)

    # Small shapes consistent with the module: N nodes, num_features, num_classes.
    N = 64          # number of graph nodes
    FEAT = 32       # num_features
    CLASSES = 8     # num_classes
    E = 256         # number of directed edges

    x = jax.random.normal(k_x, (N, FEAT), dtype=jnp.float32)
    edge_index = jax.random.randint(k_e, (2, E), 0, N, dtype=jnp.int32)

    # Deterministic parameter init, matching SAGEConv shapes:
    #   lin_l: Linear(FEAT, CLASSES, bias=True)  -> applied to mean(neighbors)
    #   lin_r: Linear(FEAT, CLASSES, bias=False) -> applied to root node
    scale = 1.0 / jnp.sqrt(jnp.float32(FEAT))
    w_l = jax.random.uniform(k_wl, (CLASSES, FEAT), jnp.float32, -scale, scale)
    w_r = jax.random.uniform(k_wr, (CLASSES, FEAT), jnp.float32, -scale, scale)
    b_l = jax.random.uniform(k_b, (CLASSES,), jnp.float32, -scale, scale)

    y = gcn_forward(x, edge_index, w_l, w_r, b_l)
    y = jax.block_until_ready(y)

    y_ref = reference_forward(x, edge_index, w_l, w_r, b_l)
    assert y.shape == (N, CLASSES)
    assert jnp.allclose(y, y_ref, atol=1e-4, rtol=1e-4), "mismatch vs reference"

    print("KERNEL_OK")
</pallas_src>

<mosaic_0001>
module attributes {stable_mosaic.version = 11 : i64} {
  func.func @sage_relu_kernel(%arg0: i32, %arg1: i32, %arg2: memref<128x128xf32, #tpu.memory_space<vmem>>, %arg3: memref<128x64xf32, #tpu.memory_space<vmem>>, %arg4: memref<128x64xf32, #tpu.memory_space<vmem>>, %arg5: memref<64x128xf32, #tpu.memory_space<vmem>>, %arg6: memref<1x128xf32, #tpu.memory_space<vmem>>, %arg7: memref<128x128xf32, #tpu.memory_space<vmem>>, %arg8: memref<128x64xf32, #tpu.memory_space<vmem>>) attributes {dimension_semantics = [#tpu.dimension_semantics<parallel>, #tpu.dimension_semantics<arbitrary>], iteration_bounds = array<i64: 1, 1>, scalar_prefetch = 0 : i64, scratch_operands = 1 : i64, tpu.core_type = #tpu.core_type<tc>, window_params = [{transform_indices = @transform_0, window_bounds = array<i64: 128, 128>}, {transform_indices = @transform_1, window_bounds = array<i64: 128, 64>}, {transform_indices = @transform_2, window_bounds = array<i64: 128, 64>}, {pipeline_mode = #tpu.pipeline_mode<synchronous>, transform_indices = @transform_3, window_bounds = array<i64: 64, 128>}, {pipeline_mode = #tpu.pipeline_mode<synchronous>, transform_indices = @transform_4, window_bounds = array<i64: 1, 128>}, {transform_indices = @transform_5, window_bounds = array<i64: 128, 128>}]} {
    %c0_i32 = arith.constant 0 : i32
    %0 = arith.cmpi eq, %arg1, %c0_i32 : i32
    %1 = arith.extui %0 : i1 to i32
    %c0_i32_0 = arith.constant 0 : i32
    %2 = arith.cmpi ne, %1, %c0_i32_0 : i32
    scf.if %2 {
      %c0_10 = arith.constant 0 : index
      %c0_11 = arith.constant 0 : index
      %12 = vector.load %arg4[%c0_10, %c0_11] : memref<128x64xf32, #tpu.memory_space<vmem>>, vector<128x64xf32>
      %c0_12 = arith.constant 0 : index
      %c0_13 = arith.constant 0 : index
      %13 = vector.load %arg8[%c0_12, %c0_13] : memref<128x64xf32, #tpu.memory_space<vmem>>, vector<128x64xf32>
      tpu.vector_store %arg8[%c0_12, %c0_13], %12 {strides = array<i32>} : memref<128x64xf32, #tpu.memory_space<vmem>>, vector<128x64xf32>,
    } else {
    }
    %c0 = arith.constant 0 : index
    %c0_1 = arith.constant 0 : index
    %3 = vector.load %arg8[%c0, %c0_1] : memref<128x64xf32, #tpu.memory_space<vmem>>, vector<128x64xf32>
    %c0_2 = arith.constant 0 : index
    %c0_3 = arith.constant 0 : index
    %4 = vector.load %arg2[%c0_2, %c0_3] : memref<128x128xf32, #tpu.memory_space<vmem>>, vector<128x128xf32>
    %c0_4 = arith.constant 0 : index
    %c0_5 = arith.constant 0 : index
    %5 = vector.load %arg3[%c0_4, %c0_5] : memref<128x64xf32, #tpu.memory_space<vmem>>, vector<128x64xf32>
    %cst = arith.constant dense<0.000000e+00> : vector<128x64xf32>
    %6 = tpu.matmul %4, %5, %cst {dimension_numbers = #tpu.dot_dimension_numbers<[1], [0], [0], [1], [0, 0, 1, 1], [], []>} : vector<128x128xf32>, vector<128x64xf32>, vector<128x64xf32> -> vector<128x64xf32>
    %7 = arith.addf %3, %6 : vector<128x64xf32>
    %c0_6 = arith.constant 0 : index
    %c0_7 = arith.constant 0 : index
    %8 = vector.load %arg8[%c0_6, %c0_7] : memref<128x64xf32, #tpu.memory_space<vmem>>, vector<128x64xf32>
    tpu.vector_store %arg8[%c0_6, %c0_7], %7 {strides = array<i32>} : memref<128x64xf32, #tpu.memory_space<vmem>>, vector<128x64xf32>,
    %c0_i32_8 = arith.constant 0 : i32
    %9 = arith.cmpi eq, %arg1, %c0_i32_8 : i32
    %10 = arith.extui %9 : i1 to i32
    %c0_i32_9 = arith.constant 0 : i32
    %11 = arith.cmpi ne, %10, %c0_i32_9 : i32
    scf.if %11 {
      %c0_10 = arith.constant 0 : index
      %c0_11 = arith.constant 0 : index
      %12 = vector.load %arg8[%c0_10, %c0_11] : memref<128x64xf32, #tpu.memory_space<vmem>>, vector<128x64xf32>
      %c0_12 = arith.constant 0 : index
      %c0_13 = arith.constant 0 : index
      %13 = vector.load %arg5[%c0_12, %c0_13] : memref<64x128xf32, #tpu.memory_space<vmem>>, vector<64x128xf32>
      %cst_14 = arith.constant dense<0.000000e+00> : vector<128x128xf32>
      %14 = tpu.matmul %12, %13, %cst_14 {dimension_numbers = #tpu.dot_dimension_numbers<[1], [0], [0], [1], [0, 0, 1, 1], [], []>} : vector<128x64xf32>, vector<64x128xf32>, vector<128x128xf32> -> vector<128x128xf32>
      %c0_15 = arith.constant 0 : index
      %c0_16 = arith.constant 0 : index
      %15 = vector.load %arg6[%c0_15, %c0_16] : memref<1x128xf32, #tpu.memory_space<vmem>>, vector<1x128xf32>
      %16 = vector.broadcast %15 : vector<1x128xf32> to vector<128x128xf32>
      %17 = arith.addf %14, %16 : vector<128x128xf32>
      %cst_17 = arith.constant 0.000000e+00 : f32
      %18 = vector.broadcast %cst_17 : f32 to vector<128x128xf32>
      %19 = arith.maximumf %17, %18 : vector<128x128xf32>
      %c0_18 = arith.constant 0 : index
      %c0_19 = arith.constant 0 : index
      %20 = vector.load %arg7[%c0_18, %c0_19] : memref<128x128xf32, #tpu.memory_space<vmem>>, vector<128x128xf32>
      tpu.vector_store %arg7[%c0_18, %c0_19], %19 {strides = array<i32>} : memref<128x128xf32, #tpu.memory_space<vmem>>, vector<128x128xf32>,
    } else {
    }
    return
  }
  func.func @transform_0(%arg0: i32, %arg1: i32) -> (i32, i32) {
    %c0_i32 = arith.constant 0 : i32
    return %arg0, %arg1 : i32, i32
  }
  func.func @transform_1(%arg0: i32, %arg1: i32) -> (i32, i32) {
    %c0_i32 = arith.constant 0 : i32
    %c0_i32_0 = arith.constant 0 : i32
    return %arg1, %c0_i32 : i32, i32
  }
  func.func @transform_2(%arg0: i32, %arg1: i32) -> (i32, i32) {
    %c0_i32 = arith.constant 0 : i32
    %c0_i32_0 = arith.constant 0 : i32
    return %arg0, %c0_i32 : i32, i32
  }
  func.func @transform_3(%arg0: i32, %arg1: i32) -> (i32, i32) {
    %c0_i32 = arith.constant 0 : i32
    %c0_i32_0 = arith.constant 0 : i32
    %c0_i32_1 = arith.constant 0 : i32
    return %c0_i32, %c0_i32_0 : i32, i32
  }
  func.func @transform_4(%arg0: i32, %arg1: i32) -> (i32, i32) {
    %c0_i32 = arith.constant 0 : i32
    %c0_i32_0 = arith.constant 0 : i32
    %c0_i32_1 = arith.constant 0 : i32
    return %c0_i32, %c0_i32_0 : i32, i32
  }
  func.func @transform_5(%arg0: i32, %arg1: i32) -> (i32, i32) {
    %c0_i32 = arith.constant 0 : i32
    %c0_i32_0 = arith.constant 0 : i32
    return %arg0, %c0_i32 : i32, i32
  }
}

</mosaic_0001>

<bundles_post_ra>
// kernel: tpu_custom_call.1
= control target key start
LH: loop header
LB: loop body
LE: loop exit
PB: predicated region body
PF: predicated region fallthrough
CT: control target
= control target key end

     0   :  { %s741_s0 = inlined_call_operand.vmem [shape: f32[128,128], index: 0, kind: input, shape index: {}]   ;;  %s742_s1 = inlined_call_operand.vmem [shape: f32[128,64], index: 1, kind: input, shape index: {}]   ;;  %s743_s2 = inlined_call_operand.vmem [shape: f32[128,64], index: 2, kind: input, shape index: {}]   ;;  %s744_s3 = inlined_call_operand.vmem [shape: f32[64,128], index: 3, kind: input, shape index: {}]   ;;  %s745_s4 = inlined_call_operand.vmem [shape: f32[1,128], index: 4, kind: input, shape index: {}]   ;;  %s746_s5 = inlined_call_operand.hbm [shape: f32[128,128], index: 5, kind: output, shape index: {}]  }
   0x1   :  { %v105_v0 = vld [vmem:[%s742_s1 + $0x78] sm:$0xff]  ;;  %v104_v1 = vld [vmem:[%s742_s1 + $0x70] sm:$0xff]  ;;  %v103_v2 = vld [vmem:[%s742_s1 + $0x68] sm:$0xff] }
   0x2   :  { %106 = vmatpush.msra.mxu0 %v105_v0  ;;  %414 = vmatpush.msra.mxu2 %v105_v0  ;;  %v102_v3 = vld [vmem:[%s742_s1 + $0x60] sm:$0xff]  ;;  %v101_v4 = vld [vmem:[%s742_s1 + $0x58] sm:$0xff] }
   0x4   :  { %107 = vmatpush.msra.mxu0 %v104_v1  ;;  %415 = vmatpush.msra.mxu2 %v104_v1 }
   0x6   :  { %108 = vmatpush.msra.mxu0 %v103_v2  ;;  %416 = vmatpush.msra.mxu2 %v103_v2 }
   0x7   :  { %10 = vsyncpa [#allocation4], 0  ;;  %v100_v5 = vld [vmem:[%s742_s1 + $0x50] sm:$0xff]  ;;  %v99_v6 = vld [vmem:[%s742_s1 + $0x48] sm:$0xff]  ;;  %vm41_vm0 = vcmask 523264   ;;  %s386_s28 = sshll.u32 %s746_s5, 4  ;;  %s387_s28 = int_to_ptr.hbm [resolvable:$true] %s386_s28 }
   0x8   :  { %109 = vmatpush.msra.mxu0 %v102_v3  ;;  %417 = vmatpush.msra.mxu2 %v102_v3  ;;  %v98_v7 = vld [vmem:[%s742_s1 + $0x40] sm:$0xff]  ;;  %v97_v8 = vld [vmem:[%s742_s1 + $0x38] sm:$0xff]  ;;  %v96_v9 = vld [vmem:[%s742_s1 + $0x30] sm:$0xff]  ;;  %s469_s29 = smov 128   ;;  %s470_s30 = smov 8  }
   0x9   :  { %v95_v10 = vld [vmem:[%s742_s1 + $0x28] sm:$0xff]  ;;  %v94_v11 = vld [vmem:[%s742_s1 + $0x20] sm:$0xff]  ;;  %v93_v12 = vld [vmem:[%s742_s1 + $0x18] sm:$0xff] }
   0xa   :  { %110 = vmatpush.msra.mxu0 %v101_v4  ;;  %418 = vmatpush.msra.mxu2 %v101_v4  ;;  %v92_v13 = vld [vmem:[%s742_s1 + $0x10] sm:$0xff]  ;;  %v91_v14 = vld [vmem:[%s742_s1 + $0x8] sm:$0xff]  ;;  %v90_v15 = vld [vmem:[%s742_s1] sm:$0xff] }
   0xb   :  { %v74_v16 = vld [vmem:[%s741_s0] sm:$0xff]  ;;  %v81_v17 = vld [vmem:[%s741_s0 + $0x38] sm:$0xff]  ;;  %v75_v18 = vld [vmem:[%s741_s0 + $0x8] sm:$0xff] }
   0xc   :  { %111 = vmatpush.msra.mxu0 %v100_v5  ;;  %419 = vmatpush.msra.mxu2 %v100_v5  ;;  %v82_v19 = vld [vmem:[%s741_s0 + $0x40] sm:$0xff]  ;;  %v76_v20 = vld [vmem:[%s741_s0 + $0x10] sm:$0xff]  ;;  %v83_v21 = vld [vmem:[%s741_s0 + $0x48] sm:$0xff] }
   0xd   :  { %v77_v22 = vld [vmem:[%s741_s0 + $0x18] sm:$0xff]  ;;  %v84_v23 = vld [vmem:[%s741_s0 + $0x50] sm:$0xff]  ;;  %v78_v24 = vld [vmem:[%s741_s0 + $0x20] sm:$0xff] }
   0xe   :  { %112 = vmatpush.msra.mxu0 %v99_v6  ;;  %420 = vmatpush.msra.mxu2 %v99_v6  ;;  %v85_v25 = vld [vmem:[%s741_s0 + $0x58] sm:$0xff]  ;;  %v229_v27 = vld [vmem:[%s744_s3 + $0x30] sm:$0xff]  ;;  %v25_v28 = vld [vmem:[%s743_s2] sm:$0xff] }
   0xf   :  { %v230_v26 = vld [vmem:[%s744_s3 + $0x38] sm:$0xff]  ;;  %42 = vst.msk [vmem:[#allocation2] sm:$0xff] %vm41_vm0, %v25_v28  ;;  %v79_v29 = vld [vmem:[%s741_s0 + $0x28] sm:$0xff]  ;;  %v86_v30 = vld [vmem:[%s741_s0 + $0x60] sm:$0xff] }
  0x10   :  { %113 = vmatpush.msra.mxu0 %v98_v7  ;;  %421 = vmatpush.msra.mxu2 %v98_v7  ;;  %v80_v31 = vld [vmem:[%s741_s0 + $0x30] sm:$0xff]  ;;  %v87_v32 = vld [vmem:[%s741_s0 + $0x68] sm:$0xff]  ;;  %v89_v34 = vld [vmem:[%s741_s0 + $0x78] sm:$0xff] }
  0x11   :  { %291 = vmatpush.msra.mxu1 %v230_v26  ;;  %430 = vmatpush.msra.mxu3 %v230_v26  ;;  %v88_v33 = vld [vmem:[%s741_s0 + $0x70] sm:$0xff]  ;;  %v32_v35 = vld [vmem:[%s743_s2 + $0x38] sm:$0xff]  ;;  %v228_v36 = vld [vmem:[%s744_s3 + $0x28] sm:$0xff] }
  0x12   :  { %114 = vmatpush.msra.mxu0 %v97_v8  ;;  %422 = vmatpush.msra.mxu2 %v97_v8  ;;  %49 = vst.msk [vmem:[#allocation2 + $0x38] sm:$0xff] %vm41_vm0, %v32_v35  ;;  %v26_v37 = vld [vmem:[%s743_s2 + $0x8] sm:$0xff]  ;;  %v227_v38 = vld [vmem:[%s744_s3 + $0x20] sm:$0xff]  ;;  %v226_v39 = vld [vmem:[%s744_s3 + $0x18] sm:$0xff] }
  0x13   :  { %292 = vmatpush.msra.mxu1 %v229_v27  ;;  %431 = vmatpush.msra.mxu3 %v229_v27  ;;  %43 = vst.msk [vmem:[#allocation2 + $0x8] sm:$0xff] %vm41_vm0, %v26_v37  ;;  %v225_v40 = vld [vmem:[%s744_s3 + $0x10] sm:$0xff]  ;;  %v33_v41 = vld [vmem:[%s743_s2 + $0x40] sm:$0xff]  ;;  %v224_v42 = vld [vmem:[%s744_s3 + $0x8] sm:$0xff] }
  0x14   :  { %115 = vmatpush.msra.mxu0 %v96_v9  ;;  %423 = vmatpush.msra.mxu2 %v96_v9  ;;  %50 = vst.msk [vmem:[#allocation2 + $0x40] sm:$0xff] %vm41_vm0, %v33_v41  ;;  %v27_v43 = vld [vmem:[%s743_s2 + $0x10] sm:$0xff]  ;;  %v223_v44 = vld [vmem:[%s744_s3] sm:$0xff]  ;;  %v34_v45 = vld [vmem:[%s743_s2 + $0x48] sm:$0xff] }
  0x15   :  { %293 = vmatpush.msra.mxu1 %v228_v36  ;;  %432 = vmatpush.msra.mxu3 %v228_v36  ;;  %44 = vst.msk [vmem:[#allocation2 + $0x10] sm:$0xff] %vm41_vm0, %v27_v43  ;;  %v28_v46 = vld [vmem:[%s743_s2 + $0x18] sm:$0xff]  ;;  %v35_v47 = vld [vmem:[%s743_s2 + $0x50] sm:$0xff]  ;;  %v29_v48 = vld [vmem:[%s743_s2 + $0x20] sm:$0xff] }
  0x16   :  { %116 = vmatpush.msra.mxu0 %v95_v10  ;;  %424 = vmatpush.msra.mxu2 %v95_v10  ;;  %51 = vst.msk [vmem:[#allocation2 + $0x48] sm:$0xff] %vm41_vm0, %v34_v45  ;;  %v58_v49 = vld [vmem:[#allocation2] sm:$0xff]  ;;  %v36_v50 = vld [vmem:[%s743_s2 + $0x58] sm:$0xff]  ;;  %v30_v52 = vld [vmem:[%s743_s2 + $0x28] sm:$0xff] }
  0x17   :  { %294 = vmatpush.msra.mxu1 %v227_v38  ;;  %433 = vmatpush.msra.mxu3 %v227_v38  ;;  %45 = vst.msk [vmem:[#allocation2 + $0x18] sm:$0xff] %vm41_vm0, %v28_v46  ;;  %v37_v57 = vld [vmem:[%s743_s2 + $0x60] sm:$0xff]  ;;  %v31_v60 = vld [vmem:[%s743_s2 + $0x30] sm:$0xff]  ;;  %v38_v2 = vld [vmem:[%s743_s2 + $0x68] sm:$0xff] }
  0x18   :  { %117 = vmatpush.msra.mxu0 %v94_v11  ;;  %425 = vmatpush.msra.mxu2 %v94_v11  ;;  %52 = vst.msk [vmem:[#allocation2 + $0x50] sm:$0xff] %vm41_vm0, %v35_v47  ;;  %v39_v10 = vld [vmem:[%s743_s2 + $0x70] sm:$0xff] }
  0x19   :  { %295 = vmatpush.msra.mxu1 %v226_v39  ;;  %434 = vmatpush.msra.mxu3 %v226_v39  ;;  %46 = vst.msk [vmem:[#allocation2 + $0x20] sm:$0xff] %vm41_vm0, %v29_v48  ;;  %v65_v54 = vld [vmem:[#allocation2 + $0x38] sm:$0xff] }
  0x1a   :  { %118 = vmatpush.msra.mxu0 %v93_v12  ;;  %426 = vmatpush.msra.mxu2 %v93_v12  ;;  %53 = vst.msk [vmem:[#allocation2 + $0x58] sm:$0xff] %vm41_vm0, %v36_v50  ;;  %v59_v56 = vld [vmem:[#allocation2 + $0x8] sm:$0xff] }
  0x1b   :  { %296 = vmatpush.msra.mxu1 %v225_v40  ;;  %435 = vmatpush.msra.mxu3 %v225_v40  ;;  %47 = vst.msk [vmem:[#allocation2 + $0x28] sm:$0xff] %vm41_vm0, %v30_v52  ;;  %v66_v63 = vld [vmem:[#allocation2 + $0x40] sm:$0xff] }
  0x1c   :  { %119 = vmatpush.msra.mxu0 %v92_v13  ;;  %427 = vmatpush.msra.mxu2 %v92_v13  ;;  %54 = vst.msk [vmem:[#allocation2 + $0x60] sm:$0xff] %vm41_vm0, %v37_v57  ;;  %v60_v1 = vld [vmem:[#allocation2 + $0x10] sm:$0xff] }
  0x1d   :  { %297 = vmatpush.msra.mxu1 %v224_v42  ;;  %436 = vmatpush.msra.mxu3 %v224_v42  ;;  %48 = vst.msk [vmem:[#allocation2 + $0x30] sm:$0xff] %vm41_vm0, %v31_v60  ;;  %v67_v7 = vld [vmem:[#allocation2 + $0x48] sm:$0xff] }
  0x1e   :  { %120 = vmatpush.msra.mxu0 %v91_v14  ;;  %428 = vmatpush.msra.mxu2 %v91_v14  ;;  %55 = vst.msk [vmem:[#allocation2 + $0x68] sm:$0xff] %vm41_vm0, %v38_v2  ;;  %v61_v9 = vld [vmem:[#allocation2 + $0x18] sm:$0xff] }
  0x1f   :  { %298 = vmatpush.msra.mxu1 %v223_v44  ;;  %437 = vmatpush.msra.mxu3 %v223_v44  ;;  %56 = vst.msk [vmem:[#allocation2 + $0x70] sm:$0xff] %vm41_vm0, %v39_v10 }
  0x20   :  { %121 = vmatpush.msra.mxu0 %v90_v15  ;;  %429 = vmatpush.msra.mxu2 %v90_v15  ;;  %v68_v15 = vld [vmem:[#allocation2 + $0x50] sm:$0xff] }
  0x21   :  { %122 = vmatmul.f32.vlgmr.msra.gmra.mxu0 %v74_v16  ;;  %143 = vmatmul.f32.vlgmr.msra.gmra.mxu2 %v81_v17  ;;  %v62_v17 = vld [vmem:[#allocation2 + $0x20] sm:$0xff] }
  0x22   :  { %v63_v26 = vld [vmem:[#allocation2 + $0x28] sm:$0xff] }
  0x25   :  { %v71_v40 = vld [vmem:[#allocation2 + $0x68] sm:$0xff] }
  0x26   :  { %v72_v45 = vld [vmem:[#allocation2 + $0x70] sm:$0xff] }
  0x29   :  { %125 = vmatmul.f32.gmra.mxu0 %v75_v18  ;;  %146 = vmatmul.f32.gmra.mxu2 %v82_v19  ;;  %v40_v18 = vld [vmem:[%s743_s2 + $0x78] sm:$0xff] }
  0x2a   :  { %57 = vst.msk [vmem:[#allocation2 + $0x78] sm:$0xff] %vm41_vm0, %v40_v18 }
  0x31   :  { %128 = vmatmul.f32.gmra.mxu0 %v76_v20  ;;  %149 = vmatmul.f32.gmra.mxu2 %v83_v21  ;;  %v73_v50 = vld [vmem:[#allocation2 + $0x78] sm:$0xff] }
  0x39   :  { %131 = vmatmul.f32.gmra.mxu0 %v77_v22  ;;  %152 = vmatmul.f32.gmra.mxu2 %v84_v23 }
  0x41   :  { %134 = vmatmul.f32.gmra.mxu0 %v78_v24  ;;  %155 = vmatmul.f32.gmra.mxu2 %v85_v25  ;;  %v69_v24 = vld [vmem:[#allocation2 + $0x58] sm:$0xff] }
  0x49   :  { %137 = vmatmul.f32.gmra.mxu0 %v79_v29  ;;  %158 = vmatmul.f32.gmra.mxu2 %v86_v30 }
  0x51   :  { %140 = vmatmul.f32.gmra.mxu0 %v80_v31  ;;  %161 = vmatmul.f32.gmra.mxu2 %v87_v32  ;;  %v70_v32 = vld [vmem:[#allocation2 + $0x60] sm:$0xff] }
  0x59   :  { %164 = vmatmul.f32.gmra.mxu2 %v88_v33 }
  0x61   :  { %167 = vmatmul.f32.gmra.mxu2 %v89_v34  ;;  %v64_v34 = vld [vmem:[#allocation2 + $0x30] sm:$0xff] }
  0x9e   :  { %v123_v51 = vpop.f32.mrf.mxu0 }
  0x9f   :  { %v171_v53 = vadd.f32 %v123_v51, %v58_v49 }
  0xa1   :  { %188 = vst.msk [vmem:[#allocation2] sm:$0xff] %vm41_vm0, %v171_v53 }
  0xa4   :  { %v144_v55 = vpop.f32.mrf.mxu2 }
  0xa5   :  { %v178_v58 = vadd.f32 %v144_v55, %v65_v54 }
  0xa6   :  { %v126_v59 = vpop.f32.mrf.mxu0 }
  0xa7   :  { %195 = vst.msk [vmem:[#allocation2 + $0x38] sm:$0xff] %vm41_vm0, %v178_v58  ;;  %v172_v61 = vadd.f32 %v126_v59, %v59_v56  ;;  %v720_v56 = vld [vmem:[%s745_s4] ss:$0 sm:$0xff]  ;;  %s468_s4 = smov [#allocation3]  }
  0xa8   :  { %v207_v62 = vld [vmem:[#allocation2] sm:$0xff]  ;;  %s384_s25 = sshll.u32 %s468_s4, 4  ;;  %s385_s25 = int_to_ptr.vmem [resolvable:$true] %s384_s25 }
  0xa9   :  { %189 = vst.msk [vmem:[#allocation2 + $0x8] sm:$0xff] %vm41_vm0, %v172_v61  ;;  %398 = vmatmul.msk.f32.vlgmr.msra.gmra.mxu1 %vm41_vm0, %v207_v62 }
  0xac   :  { %v147_v0 = vpop.f32.mrf.mxu2 }
  0xad   :  { %v179_v3 = vadd.f32 %v147_v0, %v66_v63 }
  0xae   :  { %v129_v4 = vpop.f32.mrf.mxu0  ;;  %v214_v49 = vld [vmem:[#allocation2 + $0x38] sm:$0xff] }
  0xaf   :  { %196 = vst.msk [vmem:[#allocation2 + $0x40] sm:$0xff] %vm41_vm0, %v179_v3  ;;  %v173_v5 = vadd.f32 %v129_v4, %v60_v1 }
  0xb0   :  { %v208_v6 = vld [vmem:[#allocation2 + $0x8] sm:$0xff] }
  0xb1   :  { %190 = vst.msk [vmem:[#allocation2 + $0x10] sm:$0xff] %vm41_vm0, %v173_v5  ;;  %399 = vmatmul.msk.f32.gmra.mxu1 %vm41_vm0, %v208_v6 }
  0xb4   :  { %v150_v8 = vpop.f32.mrf.mxu2 }
  0xb5   :  { %v180_v11 = vadd.f32 %v150_v8, %v67_v7 }
  0xb6   :  { %v132_v12 = vpop.f32.mrf.mxu0  ;;  %v215_v54 = vld [vmem:[#allocation2 + $0x40] sm:$0xff] }
  0xb7   :  { %197 = vst.msk [vmem:[#allocation2 + $0x48] sm:$0xff] %vm41_vm0, %v180_v11  ;;  %v174_v13 = vadd.f32 %v132_v12, %v61_v9 }
  0xb8   :  { %v209_v14 = vld [vmem:[#allocation2 + $0x10] sm:$0xff] }
  0xb9   :  { %191 = vst.msk [vmem:[#allocation2 + $0x18] sm:$0xff] %vm41_vm0, %v174_v13  ;;  %400 = vmatmul.msk.f32.gmra.mxu1 %vm41_vm0, %v209_v14 }
  0xbc   :  { %v153_v16 = vpop.f32.mrf.mxu2 }
  0xbd   :  { %v181_v19 = vadd.f32 %v153_v16, %v68_v15 }
  0xbe   :  { %v135_v20 = vpop.f32.mrf.mxu0  ;;  %v216_v21 = vld [vmem:[#allocation2 + $0x48] sm:$0xff] }
  0xbf   :  { %198 = vst.msk [vmem:[#allocation2 + $0x50] sm:$0xff] %vm41_vm0, %v181_v19  ;;  %v175_v22 = vadd.f32 %v135_v20, %v62_v17  ;;  %407 = vmatmul.msk.f32.vlgmr.msra.gmra.mxu3 %vm41_vm0, %v216_v21 }
  0xc0   :  { %v210_v23 = vld [vmem:[#allocation2 + $0x18] sm:$0xff] }
  0xc1   :  { %192 = vst.msk [vmem:[#allocation2 + $0x20] sm:$0xff] %vm41_vm0, %v175_v22  ;;  %401 = vmatmul.msk.f32.gmra.mxu1 %vm41_vm0, %v210_v23 }
  0xc4   :  { %v156_v25 = vpop.f32.mrf.mxu2 }
  0xc5   :  { %v182_v27 = vadd.f32 %v156_v25, %v69_v24 }
  0xc6   :  { %v138_v28 = vpop.f32.mrf.mxu0  ;;  %v217_v29 = vld [vmem:[#allocation2 + $0x50] sm:$0xff] }
  0xc7   :  { %199 = vst.msk [vmem:[#allocation2 + $0x58] sm:$0xff] %vm41_vm0, %v182_v27  ;;  %v176_v30 = vadd.f32 %v138_v28, %v63_v26  ;;  %408 = vmatmul.msk.f32.gmra.mxu3 %vm41_vm0, %v217_v29 }
  0xc8   :  { %v211_v31 = vld [vmem:[#allocation2 + $0x20] sm:$0xff] }
  0xc9   :  { %193 = vst.msk [vmem:[#allocation2 + $0x28] sm:$0xff] %vm41_vm0, %v176_v30  ;;  %402 = vmatmul.msk.f32.gmra.mxu1 %vm41_vm0, %v211_v31 }
  0xcc   :  { %v159_v33 = vpop.f32.mrf.mxu2 }
  0xcd   :  { %v183_v35 = vadd.f32 %v159_v33, %v70_v32 }
  0xce   :  { %v141_v36 = vpop.f32.mrf.mxu0  ;;  %v218_v37 = vld [vmem:[#allocation2 + $0x58] sm:$0xff] }
  0xcf   :  { %200 = vst.msk [vmem:[#allocation2 + $0x60] sm:$0xff] %vm41_vm0, %v183_v35  ;;  %v177_v38 = vadd.f32 %v141_v36, %v64_v34  ;;  %409 = vmatmul.msk.f32.gmra.mxu3 %vm41_vm0, %v218_v37 }
  0xd0   :  { %v212_v39 = vld [vmem:[#allocation2 + $0x28] sm:$0xff] }
  0xd1   :  { %194 = vst.msk [vmem:[#allocation2 + $0x30] sm:$0xff] %vm41_vm0, %v177_v38  ;;  %403 = vmatmul.msk.f32.gmra.mxu1 %vm41_vm0, %v212_v39 }
  0xd4   :  { %v162_v41 = vpop.f32.mrf.mxu2 }
  0xd5   :  { %v184_v42 = vadd.f32 %v162_v41, %v71_v40 }
  0xd6   :  { %v219_v43 = vld [vmem:[#allocation2 + $0x60] sm:$0xff] }
  0xd7   :  { %201 = vst.msk [vmem:[#allocation2 + $0x68] sm:$0xff] %vm41_vm0, %v184_v42  ;;  %410 = vmatmul.msk.f32.gmra.mxu3 %vm41_vm0, %v219_v43 }
  0xd8   :  { %v213_v44 = vld [vmem:[#allocation2 + $0x30] sm:$0xff] }
  0xd9   :  { %404 = vmatmul.msk.f32.gmra.mxu1 %vm41_vm0, %v213_v44 }
  0xdc   :  { %v165_v46 = vpop.f32.mrf.mxu2 }
  0xdd   :  { %v185_v47 = vadd.f32 %v165_v46, %v72_v45 }
  0xde   :  { %v220_v48 = vld [vmem:[#allocation2 + $0x68] sm:$0xff] }
  0xdf   :  { %202 = vst.msk [vmem:[#allocation2 + $0x70] sm:$0xff] %vm41_vm0, %v185_v47  ;;  %411 = vmatmul.msk.f32.gmra.mxu3 %vm41_vm0, %v220_v48 }
  0xe1   :  { %405 = vmatmul.msk.f32.gmra.mxu1 %vm41_vm0, %v214_v49 }
  0xe4   :  { %v168_v51 = vpop.f32.mrf.mxu2 }
  0xe5   :  { %v186_v52 = vadd.f32 %v168_v51, %v73_v50 }
  0xe6   :  { %v221_v53 = vld [vmem:[#allocation2 + $0x70] sm:$0xff] }
  0xe7   :  { %203 = vst.msk [vmem:[#allocation2 + $0x78] sm:$0xff] %vm41_vm0, %v186_v52  ;;  %412 = vmatmul.msk.f32.gmra.mxu3 %vm41_vm0, %v221_v53 }
  0xe9   :  { %406 = vmatmul.msk.f32.gmra.mxu1 %vm41_vm0, %v215_v54 }
  0xee   :  { %v222_v55 = vld [vmem:[#allocation2 + $0x78] sm:$0xff] }
  0xef   :  { %413 = vmatmul.msk.f32.gmra.mxu3 %vm41_vm0, %v222_v55 }
 0x126   :  { %v300_v57 = vpop.f32.mrf.mxu1 }
 0x127   :  { %v301_v58 = vadd.f32 %v720_v56, %v300_v57 }
 0x129   :  { %v348_v59 = vmax.f32 %v301_v58, 0.0 }
 0x12b   :  { %364 = vst [vmem:[#allocation3] sm:$0xff] %v348_v59 }
 0x12e   :  { %v303_v60 = vpop.f32.mrf.mxu1 }
 0x12f   :  { %v304_v61 = vadd.f32 %v720_v56, %v303_v60 }
 0x131   :  { %v349_v62 = vmax.f32 %v304_v61, 0.0 }
 0x133   :  { %365 = vst [vmem:[#allocation3 + $0x8] sm:$0xff] %v349_v62 }
 0x136   :  { %v306_v63 = vpop.f32.mrf.mxu1 }
 0x137   :  { %v307_v0 = vadd.f32 %v720_v56, %v306_v63 }
 0x139   :  { %v350_v1 = vmax.f32 %v307_v0, 0.0 }
 0x13b   :  { %366 = vst [vmem:[#allocation3 + $0x10] sm:$0xff] %v350_v1 }
 0x13e   :  { %v309_v2 = vpop.f32.mrf.mxu1 }
 0x13f   :  { %v310_v3 = vadd.f32 %v720_v56, %v309_v2 }
 0x141   :  { %v351_v4 = vmax.f32 %v310_v3, 0.0 }
 0x142   :  { %v327_v5 = vpop.f32.mrf.mxu3 }
 0x143   :  { %367 = vst [vmem:[#allocation3 + $0x18] sm:$0xff] %v351_v4  ;;  %v328_v6 = vadd.f32 %v720_v56, %v327_v5 }
 0x145   :  { %v357_v7 = vmax.f32 %v328_v6, 0.0 }
 0x146   :  { %v312_v8 = vpop.f32.mrf.mxu1 }
 0x147   :  { %373 = vst [vmem:[#allocation3 + $0x48] sm:$0xff] %v357_v7  ;;  %v313_v9 = vadd.f32 %v720_v56, %v312_v8 }
 0x149   :  { %v352_v10 = vmax.f32 %v313_v9, 0.0 }
 0x14a   :  { %v330_v11 = vpop.f32.mrf.mxu3 }
 0x14b   :  { %368 = vst [vmem:[#allocation3 + $0x20] sm:$0xff] %v352_v10  ;;  %v331_v12 = vadd.f32 %v720_v56, %v330_v11 }
 0x14d   :  { %v358_v13 = vmax.f32 %v331_v12, 0.0 }
 0x14e   :  { %v315_v14 = vpop.f32.mrf.mxu1 }
 0x14f   :  { %374 = vst [vmem:[#allocation3 + $0x50] sm:$0xff] %v358_v13  ;;  %v316_v15 = vadd.f32 %v720_v56, %v315_v14 }
 0x151   :  { %v353_v16 = vmax.f32 %v316_v15, 0.0 }
 0x152   :  { %v333_v17 = vpop.f32.mrf.mxu3 }
 0x153   :  { %369 = vst [vmem:[#allocation3 + $0x28] sm:$0xff] %v353_v16  ;;  %v334_v18 = vadd.f32 %v720_v56, %v333_v17 }
 0x155   :  { %v359_v19 = vmax.f32 %v334_v18, 0.0 }
 0x156   :  { %v318_v20 = vpop.f32.mrf.mxu1 }
 0x157   :  { %375 = vst [vmem:[#allocation3 + $0x58] sm:$0xff] %v359_v19  ;;  %v319_v21 = vadd.f32 %v720_v56, %v318_v20 }
 0x159   :  { %v354_v22 = vmax.f32 %v319_v21, 0.0 }
 0x15a   :  { %v336_v23 = vpop.f32.mrf.mxu3 }
 0x15b   :  { %370 = vst [vmem:[#allocation3 + $0x30] sm:$0xff] %v354_v22  ;;  %v337_v24 = vadd.f32 %v720_v56, %v336_v23 }
 0x15d   :  { %v360_v25 = vmax.f32 %v337_v24, 0.0 }
 0x15e   :  { %v321_v26 = vpop.f32.mrf.mxu1 }
 0x15f   :  { %376 = vst [vmem:[#allocation3 + $0x60] sm:$0xff] %v360_v25  ;;  %v322_v27 = vadd.f32 %v720_v56, %v321_v26 }
 0x161   :  { %v355_v28 = vmax.f32 %v322_v27, 0.0 }
 0x162   :  { %v339_v29 = vpop.f32.mrf.mxu3 }
 0x163   :  { %371 = vst [vmem:[#allocation3 + $0x38] sm:$0xff] %v355_v28  ;;  %v340_v30 = vadd.f32 %v720_v56, %v339_v29 }
 0x165   :  { %v361_v31 = vmax.f32 %v340_v30, 0.0 }
 0x166   :  { %v324_v32 = vpop.f32.mrf.mxu1 }
 0x167   :  { %377 = vst [vmem:[#allocation3 + $0x68] sm:$0xff] %v361_v31  ;;  %v325_v33 = vadd.f32 %v720_v56, %v324_v32 }
 0x169   :  { %v356_v34 = vmax.f32 %v325_v33, 0.0 }
 0x16a   :  { %v342_v35 = vpop.f32.mrf.mxu3 }
 0x16b   :  { %372 = vst [vmem:[#allocation3 + $0x40] sm:$0xff] %v356_v34  ;;  %v343_v36 = vadd.f32 %v720_v56, %v342_v35 }
 0x16d   :  { %v362_v37 = vmax.f32 %v343_v36, 0.0 }
 0x16f   :  { %378 = vst [vmem:[#allocation3 + $0x70] sm:$0xff] %v362_v37 }
 0x172   :  { %v345_v38 = vpop.f32.mrf.mxu3 }
 0x173   :  { %v346_v39 = vadd.f32 %v720_v56, %v345_v38 }
 0x175   :  { %v363_v40 = vmax.f32 %v346_v39, 0.0 }
 0x177   :  { %379 = vst [vmem:[#allocation3 + $0x78] sm:$0xff] %v363_v40 }
 0x178   :  { %392 = dma.vmem_to_hbm [thread:$0]  %s385_s25, 2048, %s387_s28, [#allocation4], %s469_s29, %s469_s29, %s470_s30  }
 0x179   :  { %466 = dma.done.wait [#allocation4], 2048  }
 0x17a   :  { %467 = vsyncadd [#allocation4], 4294965248 }
 0x17b   :  { %397 = vsyncpa [#allocation4], 1 }

</bundles_post_ra>
